<compile_context>
chip_gen: v6e
topology: v6e:2x2x1
jax: 0.10.0
libtpu: 0.0.40
codegen_flags: <defaults>
</compile_context>

<pallas_src>
import jax
import jax.numpy as jnp
from jax.experimental import pallas as pl
from jax.experimental.pallas import tpu as pltpu


EPS = 1e-6


def _round_up(a, m):
    return (a + m - 1) // m * m


def _cdiv(a, b):
    return -(-a // b)


def _physical_vmem_bytes():
    """Best-effort physical VMEM per TensorCore; conservative fallback."""
    try:
        return int(pltpu.get_tpu_info().vmem_capacity_bytes)
    except Exception:
        pass
    try:
        kind = jax.devices()[0].device_kind.lower()
    except Exception:
        kind = ""
    if "v7" in kind:
        return 64 << 20          # v7x: 64 MiB per TensorCore
    return 128 << 20             # v4/v5e/v5p/v6e


def _vmem_estimate(tm, tn, D, out_elem_bytes):
    """Bytes of VMEM the pallas_call buffers will need (double-buffered blocks + scratch)."""
    x_block = 2 * tm * D * 4              # f32 stats/residual block
    w_block = 2 * D * tn * 2              # bf16 folded weight slab
    b_block = 2 * 8 * tn * 4              # f32 bias (sublane-padded)
    out_block = 2 * tm * tn * out_elem_bytes
    scratch = tm * D * 2                  # bf16 normalized-activation cache
    return x_block + w_block + b_block + out_block + scratch


def _pick_tn(D, budget):
    # Fully-resident weight whenever the (double-buffered) bf16 (D, D) slab leaves room for activations.
    if 2 * D * D * 2 <= budget // 2:
        return D
    # Otherwise the largest lane-aligned divisor of D (keeps stores unmasked, MXU tiles native).
    for cand in (512, 256, 128):
        if D % cand == 0:
            return cand
    return D  # no 128-multiple divisor of D; single full-width column tile


def _pick_tm(rows, D, tn, budget, out_elem_bytes):
    # When the weight must be re-streamed per row tile, larger tm raises weight reuse (FLOP/byte).
    tm_target = 256 if tn == D else 512
    n_tiles = max(1, _cdiv(rows, tm_target))
    tm = _round_up(_cdiv(rows, n_tiles), 8)
    while tm > 8 and _vmem_estimate(tm, tn, D, out_elem_bytes) > budget:
        tm = max(8, _round_up(tm // 2, 8))
    return tm


def _sublayer_connection_kernel(x_ref, w_ref, b_ref, o_ref, normed_ref):
    """Grid = (row_tiles, col_tiles).

    x_ref      : (tm, D) f32 — full-width input block (resident across the column axis).
    w_ref      : (D, tn) bf16 — affine-folded weight column slab (resident when tn == D).
    b_ref      : (1, tn) f32 — affine-folded bias slab.
    o_ref      : (tm, tn) — output column slab.
    normed_ref : (tm, D) bf16 scratch — normalized activations cached across column tiles.
    """
    j = pl.program_id(1)
    tn = o_ref.shape[-1]

    # LayerNorm statistics: once per row tile (first column tile), reused for every column tile.
    @pl.when(j == 0)
    def _():
        x = x_ref[...].astype(jnp.float32)            # (tm, D)
        d = x.shape[-1]
        mean = jnp.mean(x, axis=-1, keepdims=True)
        centered = x - mean
        var_unbiased = jnp.sum(centered * centered, axis=-1, keepdims=True) * (1.0 / (d - 1))
        std = jnp.sqrt(var_unbiased)                  # torch .std() => ddof=1
        inv = pl.reciprocal(std + EPS, approx=True)   # EUP slot, ~free
        normed_ref[...] = (centered * inv).astype(normed_ref.dtype)

    # sublayer: (affine-folded) Linear on the MXU, bf16 operands, f32 accumulation.
    s = jnp.dot(normed_ref[...], w_ref[...], preferred_element_type=jnp.float32)
    s = s + b_ref[...]

    # dropout (eval mode = identity) + residual add, residual read from the resident full-D block.
    align = 128 if tn % 128 == 0 else tn
    col0 = pl.multiple_of(j * tn, align)
    x_res = x_ref[:, pl.ds(col0, tn)].astype(jnp.float32)
    o_ref[...] = (x_res + s).astype(o_ref.dtype)


def sublayer_connection(x, scale, beta, w, b, *, tile_rows=None, tile_n=None):
    """x: (B, S, D); scale/beta: (D,); w: (D, D) with y = x @ w + b convention; b: (D,)."""
    B, S, D = x.shape
    rows = B * S
    out_elem_bytes = jnp.dtype(x.dtype).itemsize

    budget = int(_physical_vmem_bytes() * 0.75)   # ~96 MiB on 128-MiB chips, ~48 MiB on v7x

    tn = tile_n if tile_n is not None else _pick_tn(D, budget)
    tm = tile_rows if tile_rows is not None else _pick_tm(rows, D, tn, budget, out_elem_bytes)
    tm = min(tm, _round_up(rows, 8))
    rows_p = _round_up(rows, tm)

    x2 = x.reshape(rows, D)
    if rows_p != rows:
        x2 = jnp.pad(x2, ((0, rows_p - rows), (0, 0)))

    # Fold the LayerNorm affine into the linear sublayer (done once, outside the kernel):
    #   w' = scale[:, None] * w,   b' = beta @ w + b
    w_f32 = w.astype(jnp.float32)
    w_folded = (scale.astype(jnp.float32)[:, None] * w_f32).astype(jnp.bfloat16)
    b_folded = (beta.astype(jnp.float32) @ w_f32 + b.astype(jnp.float32)).reshape(1, D)

    grid = (rows_p // tm, D // tn)
    vmem_limit = min(budget, max(int(_vmem_estimate(tm, tn, D, out_elem_bytes) * 2), 16 << 20))

    out2 = pl.pallas_call(
        _sublayer_connection_kernel,
        out_shape=jax.ShapeDtypeStruct((rows_p, D), x.dtype),
        grid_spec=pltpu.PrefetchScalarGridSpec(
            num_scalar_prefetch=0,
            grid=grid,
            in_specs=[
                pl.BlockSpec((tm, D), lambda i, j: (i, 0)),   # x (stats + residual), resident over j
                pl.BlockSpec((D, tn), lambda i, j: (0, j)),   # folded weight slab (resident when tn==D)
                pl.BlockSpec((1, tn), lambda i, j: (0, j)),   # folded bias slab
            ],
            out_specs=pl.BlockSpec((tm, tn), lambda i, j: (i, j)),
            scratch_shapes=[pltpu.VMEM((tm, D), jnp.bfloat16)],  # normalized-activation cache
        ),
        compiler_params=pltpu.CompilerParams(
            dimension_semantics=("parallel", "arbitrary"),
            vmem_limit_bytes=vmem_limit,
        ),
    )(x2, w_folded, b_folded)

    if rows_p != rows:
        out2 = out2[:rows]
    return out2.reshape(B, S, D)


def reference(x, scale, beta, w, b):
    """Pure-JAX f32 reference with the module's exact semantics."""
    xf = x.astype(jnp.float32)
    d = xf.shape[-1]
    mean = jnp.mean(xf, axis=-1, keepdims=True)
    var_unbiased = jnp.sum((xf - mean) ** 2, axis=-1, keepdims=True) / (d - 1)
    std = jnp.sqrt(var_unbiased)
    y = scale * (xf - mean) / (std + EPS) + beta
    s = jnp.einsum("bsd,de->bse", y, w) + b
    return (xf + s).astype(x.dtype)


if __name__ == "__main__":
    B, S, D = 2, 8, 128   # batch=2, seq=8, d_model=128 (lane-friendly)

    key = jax.random.PRNGKey(0)
    kx, kw, kb, ks, kbt = jax.random.split(key, 5)

    x = jax.random.normal(kx, (B, S, D), dtype=jnp.float32)

    # LayerNorm params (perturbed from ones/zeros init to exercise the affine fold)
    scale = 1.0 + 0.1 * jax.random.normal(ks, (D,), dtype=jnp.float32)
    beta = 0.1 * jax.random.normal(kbt, (D,), dtype=jnp.float32)

    # Deterministic sublayer (Linear D -> D) parameters
    w = jax.random.normal(kw, (D, D), dtype=jnp.float32) * (1.0 / jnp.sqrt(D))
    b = jax.random.normal(kb, (D,), dtype=jnp.float32) * 0.01

    out = jax.block_until_ready(sublayer_connection(x, scale, beta, w, b))

    ref = reference(x, scale, beta, w, b)
    assert out.shape == (B, S, D)
    # bf16 matmul operands + approx reciprocal -> relaxed tolerance vs. exact f32 reference.
    max_err = float(jnp.max(jnp.abs(out - ref)))
    assert jnp.allclose(out, ref, atol=5e-2, rtol=5e-2), f"mismatch vs reference (max abs err {max_err})"

    print("KERNEL_OK")
</pallas_src>

<mosaic_0001>
module attributes {stable_mosaic.version = 11 : i64} {
  func.func @_sublayer_connection_kernel(%arg0: i32, %arg1: i32, %arg2: memref<16x128xf32, #tpu.memory_space<vmem>>, %arg3: memref<128x128xbf16, #tpu.memory_space<vmem>>, %arg4: memref<1x128xf32, #tpu.memory_space<vmem>>, %arg5: memref<16x128xf32, #tpu.memory_space<vmem>>, %arg6: memref<16x128xbf16, #tpu.memory_space<vmem>>) attributes {dimension_semantics = [#tpu.dimension_semantics<parallel>, #tpu.dimension_semantics<arbitrary>], iteration_bounds = array<i64: 1, 1>, scalar_prefetch = 0 : i64, scratch_operands = 1 : i64, tpu.core_type = #tpu.core_type<tc>, window_params = [{transform_indices = @transform_0, window_bounds = array<i64: 16, 128>}, {transform_indices = @transform_1, window_bounds = array<i64: 128, 128>}, {transform_indices = @transform_2, window_bounds = array<i64: 1, 128>}, {transform_indices = @transform_3, window_bounds = array<i64: 16, 128>}]} {
    %c0_i32 = arith.constant 0 : i32
    %0 = arith.cmpi eq, %arg1, %c0_i32 : i32
    %1 = arith.extui %0 : i1 to i32
    %c0_i32_0 = arith.constant 0 : i32
    %2 = arith.cmpi ne, %1, %c0_i32_0 : i32
    scf.if %2 {
      %c0_9 = arith.constant 0 : index
      %c0_10 = arith.constant 0 : index
      %15 = vector.load %arg2[%c0_9, %c0_10] : memref<16x128xf32, #tpu.memory_space<vmem>>, vector<16x128xf32>
      %cst_11 = arith.constant dense<0.000000e+00> : vector<16xf32>
      %16 = vector.multi_reduction <add>, %15, %cst_11 [1] : vector<16x128xf32> to vector<16xf32>
      %17 = vector.shape_cast %16 : vector<16xf32> to vector<16x1xf32>
      %cst_12 = arith.constant 1.280000e+02 : f32
      %18 = vector.broadcast %cst_12 : f32 to vector<16x1xf32>
      %19 = arith.divf %17, %18 : vector<16x1xf32>
      %20 = vector.broadcast %19 : vector<16x1xf32> to vector<16x128xf32>
      %21 = arith.subf %15, %20 : vector<16x128xf32>
      %22 = arith.mulf %21, %21 : vector<16x128xf32>
      %cst_13 = arith.constant dense<0.000000e+00> : vector<16xf32>
      %23 = vector.multi_reduction <add>, %22, %cst_13 [1] : vector<16x128xf32> to vector<16xf32>
      %24 = vector.shape_cast %23 : vector<16xf32> to vector<16x1xf32>
      %cst_14 = arith.constant 0.00787401571 : f32
      %25 = vector.broadcast %cst_14 : f32 to vector<16x1xf32>
      %26 = arith.mulf %24, %25 : vector<16x1xf32>
      %27 = math.sqrt %26 : vector<16x1xf32>
      %cst_15 = arith.constant 9.99999997E-7 : f32
      %28 = vector.broadcast %cst_15 : f32 to vector<16x1xf32>
      %29 = arith.addf %27, %28 : vector<16x1xf32>
      %30 = tpu.reciprocal %29 {approx = true} : vector<16x1xf32> -> vector<16x1xf32>
      %31 = vector.broadcast %30 : vector<16x1xf32> to vector<16x128xf32>
      %32 = arith.mulf %21, %31 : vector<16x128xf32>
      %33 = arith.truncf %32 : vector<16x128xf32> to vector<16x128xbf16>
      %c0_16 = arith.constant 0 : index
      %c0_17 = arith.constant 0 : index
      %34 = vector.load %arg6[%c0_16, %c0_17] : memref<16x128xbf16, #tpu.memory_space<vmem>>, vector<16x128xbf16>
      tpu.vector_store %arg6[%c0_16, %c0_17], %33 {strides = array<i32>} : memref<16x128xbf16, #tpu.memory_space<vmem>>, vector<16x128xbf16>,
    } else {
    }
    %c0 = arith.constant 0 : index
    %c0_1 = arith.constant 0 : index
    %3 = vector.load %arg6[%c0, %c0_1] : memref<16x128xbf16, #tpu.memory_space<vmem>>, vector<16x128xbf16>
    %c0_2 = arith.constant 0 : index
    %c0_3 = arith.constant 0 : index
    %4 = vector.load %arg3[%c0_2, %c0_3] : memref<128x128xbf16, #tpu.memory_space<vmem>>, vector<128x128xbf16>
    %cst = arith.constant dense<0.000000e+00> : vector<16x128xf32>
    %5 = tpu.matmul %3, %4, %cst {dimension_numbers = #tpu.dot_dimension_numbers<[1], [0], [0], [1], [0, 0, 1, 1], [], []>} : vector<16x128xbf16>, vector<128x128xbf16>, vector<16x128xf32> -> vector<16x128xf32>
    %c0_4 = arith.constant 0 : index
    %c0_5 = arith.constant 0 : index
    %6 = vector.load %arg4[%c0_4, %c0_5] : memref<1x128xf32, #tpu.memory_space<vmem>>, vector<1x128xf32>
    %7 = vector.broadcast %6 : vector<1x128xf32> to vector<16x128xf32>
    %8 = arith.addf %5, %7 : vector<16x128xf32>
    %c128_i32 = arith.constant 128 : i32
    %9 = arith.muli %arg1, %c128_i32 : i32
    %10 = tpu.assume_multiple %9, 128 : i32
    %c0_6 = arith.constant 0 : index
    %11 = arith.index_cast %10 : i32 to index
    %12 = vector.load %arg2[%c0_6, %11] : memref<16x128xf32, #tpu.memory_space<vmem>>, vector<16x128xf32>
    %13 = arith.addf %12, %8 : vector<16x128xf32>
    %c0_7 = arith.constant 0 : index
    %c0_8 = arith.constant 0 : index
    %14 = vector.load %arg5[%c0_7, %c0_8] : memref<16x128xf32, #tpu.memory_space<vmem>>, vector<16x128xf32>
    tpu.vector_store %arg5[%c0_7, %c0_8], %13 {strides = array<i32>} : memref<16x128xf32, #tpu.memory_space<vmem>>, vector<16x128xf32>,
    return
  }
  func.func @transform_0(%arg0: i32, %arg1: i32) -> (i32, i32) {
    %c0_i32 = arith.constant 0 : i32
    %c0_i32_0 = arith.constant 0 : i32
    return %arg0, %c0_i32 : i32, i32
  }
  func.func @transform_1(%arg0: i32, %arg1: i32) -> (i32, i32) {
    %c0_i32 = arith.constant 0 : i32
    %c0_i32_0 = arith.constant 0 : i32
    return %c0_i32, %arg1 : i32, i32
  }
  func.func @transform_2(%arg0: i32, %arg1: i32) -> (i32, i32) {
    %c0_i32 = arith.constant 0 : i32
    %c0_i32_0 = arith.constant 0 : i32
    return %c0_i32, %arg1 : i32, i32
  }
  func.func @transform_3(%arg0: i32, %arg1: i32) -> (i32, i32) {
    %c0_i32 = arith.constant 0 : i32
    return %arg0, %arg1 : i32, i32
  }
}

</mosaic_0001>

<bundles_post_ra>
// kernel: tpu_custom_call.1
= control target key start
LH: loop header
LB: loop body
LE: loop exit
PB: predicated region body
PF: predicated region fallthrough
CT: control target
= control target key end

     0   :  { %8 = vsyncpa [#allocation4], 0  ;;  %s443_s0 = inlined_call_operand.hbm [shape: f32[16,128], index: 0, kind: input, shape index: {}]   ;;  %s444_s1 = inlined_call_operand.hbm [shape: bf16[128,128], index: 1, kind: input, shape index: {}]   ;;  %s445_s2 = inlined_call_operand.vmem [shape: f32[1,128], index: 2, kind: input, shape index: {}]   ;;  %s446_s3 = inlined_call_operand.hbm [shape: f32[16,128], index: 3, kind: output, shape index: {}]  }
   0x1   :  { %9 = vsyncpa [#allocation7], 0 }
   0x2   :  { %10 = vsyncpa [#allocation5], 0  ;;  %s386_s12 = smov [#allocation3]  }
   0x3   :  { %s16_s13 = sshll.u32 %s386_s12, 4  ;;  %s17_s13 = int_to_ptr.vmem [resolvable:$true] %s16_s13 }
   0x4   :  { %s328_s14 = scalar_lea.vmem %s17_s13, 256  ;;  %p333_p1 = scmp.lt.s32.totalorder %s17_s13, %s17_s13 }
   0x5   :  { %p329_p0 = scmp.ne.s32.totalorder %s17_s13, %s328_s14  ;;  %p334_p2 = scmp.lt.s32.totalorder %s328_s14, %s328_s14 }
   0x7   :  { %p335_p3 = por %p334_p2, %p333_p1 }
   0x9   :  { %p336_p4 = pnand %p335_p3, %p329_p0 }
   0xb   :  { %339 = shalt.err (!%p336_p4)
}
   0xc   :  { %s387_s15 = smov 128   ;;  %s388_s16 = smov 8  }
   0xd   :  { %22 = dma.hbm_to_vmem [thread:$0]  %s443_s0, 256, %s17_s13, [#allocation4], %s387_s15, %s387_s15, %s388_s16  }
   0xe   :  { %s389_s19 = smov [#allocation6]  }
   0xf   :  { %s28_s20 = sshll.u32 %s389_s19, 4  ;;  %s29_s20 = int_to_ptr.vmem [resolvable:$true] %s28_s20 }
  0x10   :  { %s348_s21 = scalar_lea.vmem %s29_s20, 1024  ;;  %p353_p6 = scmp.lt.s32.totalorder %s29_s20, %s29_s20 }
  0x11   :  { %p349_p5 = scmp.ne.s32.totalorder %s29_s20, %s348_s21  ;;  %p354_p7 = scmp.lt.s32.totalorder %s348_s21, %s348_s21 }
  0x13   :  { %p355_p8 = por %p354_p7, %p353_p6 }
  0x15   :  { %p356_p9 = pnand %p355_p8, %p349_p5 }
  0x17   :  { %359 = shalt.err (!%p356_p9)
}
  0x18   :  { %s390_s22 = smov 64   ;;  %s391_s23 = smov 4  }
  0x19   :  { %34 = dma.hbm_to_vmem [thread:$0]  %s444_s1, 1024, %s29_s20, [#allocation7], %s390_s22, %s390_s22, %s391_s23  }
  0x1a   :  { %380 = dma.done.wait [#allocation4], 256  }
  0x1b   :  { %381 = vsyncadd [#allocation4], 4294967040 }
  0x1c   :  { %382 = dma.done.wait [#allocation7], 1024  }
  0x1d   :  { %383 = vsyncadd [#allocation7], 4294966272  ;;  %v424_v0 = vld [vmem:[#allocation3] sm:$0xff]  ;;  %v426_v1 = vld [vmem:[#allocation3 + $0x8] sm:$0xff]  ;;  %v392_v11 = vmov 0.0   ;;  %vm393_vm0 = vmmov 0  }
  0x1e   :  { %50 = vadd.xlane.f32.xlu0 %v424_v0  ;;  %v303_v10 = vld [vmem:[#allocation6 + $0x38] sm:$0xff]   ;;  %274 = vmatprep.subr.bf16.mxu0 %v392_v11  ;;  %v304_v12 = vld [vmem:[#allocation6 + $0x30] sm:$0xff]   ;;  %v305_v13 = vld [vmem:[#allocation6 + $0x28] sm:$0xff]   ;;  %s394_s26 = smov [#allocation8]  }
  0x1f   :  { %275 = vmatpush3.bf16.msra.mxu0 %v303_v10  ;;  %v306_v14 = vld [vmem:[#allocation6 + $0x20] sm:$0xff]   ;;  %v307_v15 = vld [vmem:[#allocation6 + $0x18] sm:$0xff]   ;;  %v308_v16 = vld [vmem:[#allocation6 + $0x10] sm:$0xff]   ;;  %290 = vmatprep.mubr.msk.bf16.mxu0 %vm393_vm0, %v392_v11  ;;  %s232_s27 = sshll.u32 %s394_s26, 4  ;;  %s233_s27 = int_to_ptr.vmem [resolvable:$true] %s232_s27 }
  0x20   :  { %276 = vmatprep.subr.bf16.mxu0 %v392_v11  ;;  %v309_v17 = vld [vmem:[#allocation6 + $0x8] sm:$0xff]   ;;  %v310_v18 = vld [vmem:[#allocation6] sm:$0xff]   ;;  %s360_s28 = scalar_lea.vmem %s233_s27, 256  ;;  %p365_p11 = scmp.lt.s32.totalorder %s233_s27, %s233_s27 }
  0x21   :  { %v248_v41 = vld [vmem:[%s445_s2] ss:$0 sm:$0xff]  ;;  %p361_p10 = scmp.ne.s32.totalorder %s233_s27, %s360_s28  ;;  %p366_p12 = scmp.lt.s32.totalorder %s360_s28, %s360_s28 }
  0x22   :  { %52 = vadd.xlane.f32.xlu0 %v426_v1 }
  0x23   :  { %277 = vmatpush3.bf16.msra.mxu0 %v304_v12  ;;  %p367_p13 = por %p366_p12, %p365_p11 }
  0x24   :  { %278 = vmatprep.subr.bf16.mxu0 %v392_v11 }
  0x25   :  { %p368_p0 = pnand %p367_p13, %p361_p10 }
  0x27   :  { %279 = vmatpush3.bf16.msra.mxu0 %v305_v13 }
  0x28   :  { %280 = vmatprep.subr.bf16.mxu0 %v392_v11 }
  0x2b   :  { %281 = vmatpush3.bf16.msra.mxu0 %v306_v14 }
  0x2c   :  { %282 = vmatprep.subr.bf16.mxu0 %v392_v11 }
  0x2f   :  { %283 = vmatpush3.bf16.msra.mxu0 %v307_v15 }
  0x30   :  { %284 = vmatprep.subr.bf16.mxu0 %v392_v11 }
  0x33   :  { %285 = vmatpush3.bf16.msra.mxu0 %v308_v16 }
  0x34   :  { %286 = vmatprep.subr.bf16.mxu0 %v392_v11 }
  0x37   :  { %287 = vmatpush3.bf16.msra.mxu0 %v309_v17 }
  0x38   :  { %288 = vmatprep.subr.bf16.mxu0 %v392_v11 }
  0x3b   :  { %289 = vmatpush3.bf16.msra.mxu0 %v310_v18 }
  0xa7   :  { %v51_v2 = vpop.xlane.xlu0 %50 }
  0xa8   :  { %v55_v3 = vmul.f32 0.0078125, %v51_v2 }
  0xaa   :  { %v57_v4 = vsub.f32 %v424_v0, %v55_v3 }
  0xab   :  { %v53_v5 = vpop.xlane.xlu0 %52 }
  0xac   :  { %v56_v6 = vmul.f32 0.0078125, %v53_v5  ;;  %v59_v7 = vmul.f32 %v57_v4, %v57_v4 }
  0xae   :  { %v58_v8 = vsub.f32 %v426_v1, %v56_v6  ;;  %61 = vadd.xlane.f32.xlu1 %v59_v7 }
  0xb0   :  { %v60_v9 = vmul.f32 %v58_v8, %v58_v8 }
  0xb2   :  { %63 = vadd.xlane.f32.xlu1 %v60_v9 }
 0x137   :  { %v62_v19 = vpop.xlane.xlu1 %61 }
 0x138   :  { %v65_v20 = vmul.f32 0.007874016, %v62_v19 }
 0x13a   :  { %312 = vrsqrt.f32 %v65_v20  ;;  %vm69_vm1 = vcmp.eq.f32.partialorder %v65_v20, inf  ;;  %v72_v25 = vand.u32 2147483648, %v65_v20  ;;  %vm71_vm2 = vcmp.eq.f32.partialorder %v65_v20, 0.0 }
 0x13b   :  { %v64_v21 = vpop.xlane.xlu1 %63 }
 0x13c   :  { %v66_v22 = vmul.f32 0.007874016, %v64_v21 }
 0x13e   :  { %314 = vrsqrt.f32 %v66_v22  ;;  %vm76_vm3 = vcmp.eq.f32.partialorder %v66_v22, inf  ;;  %v79_v31 = vand.u32 2147483648, %v66_v22  ;;  %vm78_vm4 = vcmp.eq.f32.partialorder %v66_v22, 0.0 }
 0x147   :  { %v313_v23 = vpop.eup %312 }
 0x148   :  { %v68_v24 = vmul.f32 %v313_v23, %v65_v20 }
 0x14a   :  { %v70_v26 = vsel %vm69_vm1, %v65_v20, %v68_v24 }
 0x14b   :  { %v315_v27 = vpop.eup %314  ;;  %v73_v28 = vsel %vm71_vm2, %v72_v25, %v70_v26 }
 0x14c   :  { %v81_v29 = vadd.f32 1e-06, %v73_v28  ;;  %v75_v30 = vmul.f32 %v315_v27, %v66_v22 }
 0x14e   :  { %v77_v32 = vsel %vm76_vm3, %v66_v22, %v75_v30  ;;  %316 = vrcp.f32 %v81_v29 }
 0x14f   :  { %v80_v33 = vsel %vm78_vm4, %v79_v31, %v77_v32 }
 0x150   :  { %v82_v34 = vadd.f32 1e-06, %v80_v33 }
 0x152   :  { %318 = vrcp.f32 %v82_v34 }
 0x15b   :  { %v317_v35 = vpop.eup %316 }
 0x15c   :  { %v85_v37 = vmul.f32 %v317_v35, %v57_v4 }
 0x15f   :  { %v319_v36 = vpop.eup %318 }
 0x160   :  { %v86_v38 = vmul.f32 %v319_v36, %v58_v8 }
 0x162   :  { %v263_v39 = vpack.c.bf16 %v86_v38, %v85_v37 }
 0x164   :  { %264 = vst [vmem:[#allocation2] sm:$0xff] %v263_v39  }
 0x16b   :  { %v311_v40 = vld [vmem:[#allocation2] sm:$0xff]  }
 0x16c   :  { %291 = vmatmul.mubr.bf16.vlgmr.msra.gmra.mxu0 %v311_v40 }
 0x22c   :  { %v210_v42 = vpop.f32.mrf.mxu0 }
 0x22d   :  { %v211_v43 = vadd.f32 %v248_v41, %v210_v42 }
 0x22e   :  { %v292_v44 = vpop.f32.mrf.mxu0 }
 0x22f   :  { %v223_v45 = vadd.f32 %v211_v43, %v424_v0 }
 0x230   :  { %v213_v46 = vpop.f32.mrf.mxu0 }
 0x231   :  { %225 = vst [vmem:[#allocation8] sm:$0xff] %v223_v45  ;;  %v214_v47 = vadd.f32 %v248_v41, %v213_v46 }
 0x232   :  { %v293_v48 = vpop.f32.mrf.mxu0 }
 0x233   :  { %v224_v49 = vadd.f32 %v214_v47, %v426_v1 }
 0x235   :  { %226 = vst [vmem:[#allocation8 + $0x8] sm:$0xff] %v224_v49 }
 0x236   :  { %371 = shalt.err (!%p368_p0)
}
 0x237   :  { %238 = dma.vmem_to_hbm [thread:$0]  %s233_s27, 256, %s446_s3, [#allocation5], %s387_s15, %s387_s15, %s388_s16  }
 0x238   :  { %384 = dma.done.wait [#allocation5], 256  }
 0x239   :  { %385 = vsyncadd [#allocation5], 4294967040 }
 0x23a   :  { %242 = vsyncpa [#allocation4], 1 }
 0x23b   :  { %243 = vsyncpa [#allocation7], 1 }
 0x23c   :  { %244 = vsyncpa [#allocation5], 1 }

</bundles_post_ra>
